<compile_context>
chip_gen: v5e
topology: v5e:2x2
jax: 0.10.0
libtpu: 0.0.40
codegen_flags: <defaults>
</compile_context>

<pallas_src>
import math
from functools import partial

import jax
import jax.numpy as jnp
from jax import lax
from jax.experimental import pallas as pl
from jax.experimental.pallas import tpu as pltpu


# ------------------------------------------------------------------ kernels --

def _full_attention_kernel(q_ref, k_ref, v_ref, o_ref, a_ref, bias_ref, *,
                           inv_temperature):
    """One (hb heads, tq queries) block against the full key length."""
    q = q_ref[...]                                   # (hb, tq, Dk) native dtype
    k = k_ref[...]                                   # (hb, Lk, Dk)
    v = v_ref[...]                                   # (hb, Lk, Dv)

    # q @ k^T per head: contract the last dims of both operands so the
    # transpose folds into the MXU dimension numbers; f32 accumulation.
    s = lax.dot_general(q, k, (((2,), (2,)), ((0,), (0,))),
                        preferred_element_type=jnp.float32)   # (hb, tq, Lk)
    s = s * inv_temperature
    if bias_ref is not None:
        s = s + bias_ref[...].astype(jnp.float32)    # additive mask bias

    # Numerically stable softmax in f32.  Exact reciprocal: the returned
    # probabilities must sum to 1 (approx=True was outside reference tol).
    s_max = jnp.max(s, axis=-1, keepdims=True)
    p = jnp.exp(s - s_max)
    denom = jnp.sum(p, axis=-1, keepdims=True)
    attn = p * pl.reciprocal(denom, approx=False)

    out = lax.dot_general(attn.astype(v.dtype), v, (((2,), (1,)), ((0,), (0,))),
                          preferred_element_type=jnp.float32)  # (hb, tq, Dv)
    o_ref[...] = out.astype(o_ref.dtype)
    if a_ref is not None:
        a_ref[...] = attn.astype(a_ref.dtype)


def _flash_attention_kernel(q_ref, k_ref, v_ref, o_ref, bias_ref,
                            m_sc, l_sc, acc_sc, *, inv_temperature):
    """Online-softmax step over one key/value tile (kv tile = grid axis 3)."""
    kv = pl.program_id(3)

    @pl.when(kv == 0)
    def _():
        m_sc[...] = jnp.full_like(m_sc, -jnp.inf)
        l_sc[...] = jnp.zeros_like(l_sc)
        acc_sc[...] = jnp.zeros_like(acc_sc)

    q = q_ref[...]                                   # (hb, tq, Dk)
    k = k_ref[...]                                   # (hb, tk, Dk)
    v = v_ref[...]                                   # (hb, tk, Dv)

    s = lax.dot_general(q, k, (((2,), (2,)), ((0,), (0,))),
                        preferred_element_type=jnp.float32)   # (hb, tq, tk)
    s = s * inv_temperature
    if bias_ref is not None:
        s = s + bias_ref[...].astype(jnp.float32)

    m_prev = m_sc[...]
    m_new = jnp.maximum(m_prev, jnp.max(s, axis=-1, keepdims=True))
    alpha = jnp.exp(m_prev - m_new)
    p = jnp.exp(s - m_new)
    l_sc[...] = alpha * l_sc[...] + jnp.sum(p, axis=-1, keepdims=True)
    acc_sc[...] = alpha * acc_sc[...] + lax.dot_general(
        p.astype(v.dtype), v, (((2,), (1,)), ((0,), (0,))),
        preferred_element_type=jnp.float32)
    m_sc[...] = m_new

    @pl.when(kv == pl.num_programs(3) - 1)
    def _():
        o_ref[...] = (acc_sc[...] * pl.reciprocal(l_sc[...], approx=False)
                      ).astype(o_ref.dtype)


def _make_full_kernel(inv_temperature, has_bias):
    def kernel(*refs):
        q_ref, k_ref, v_ref = refs[:3]
        idx = 3
        bias_ref = refs[idx] if has_bias else None
        idx += int(has_bias)
        o_ref, a_ref = refs[idx], refs[idx + 1]
        _full_attention_kernel(q_ref, k_ref, v_ref, o_ref, a_ref, bias_ref,
                               inv_temperature=inv_temperature)
    return kernel


def _make_flash_kernel(inv_temperature, has_bias):
    def kernel(*refs):
        q_ref, k_ref, v_ref = refs[:3]
        idx = 3
        bias_ref = refs[idx] if has_bias else None
        idx += int(has_bias)
        o_ref = refs[idx]
        m_sc, l_sc, acc_sc = refs[idx + 1:idx + 4]
        _flash_attention_kernel(q_ref, k_ref, v_ref, o_ref, bias_ref,
                                m_sc, l_sc, acc_sc,
                                inv_temperature=inv_temperature)
    return kernel


# --------------------------------------------------------------- tiling etc --

def _vmem_budgets():
    """(tiling budget, vmem_limit_bytes) derived from the actual chip.

    ~2/3 of physical VMEM for the compiler limit (v5e/v6e ~85 MiB, v7x ~42 MiB)
    and half of that as the tile-sizing budget.  Falls back to the smallest
    generation (v7x, 64 MiB) if the query is unavailable (CPU / interpret).
    """
    try:
        cap = int(pltpu.get_tpu_info().vmem_capacity_bytes)
    except Exception:
        cap = 64 * 1024 * 1024
    limit = min((cap * 2) // 3, 96 * 1024 * 1024)
    return limit // 2, limit


def _pick_q_tile(Lq):
    """Return (tq, padded_Lq)."""
    if Lq <= 512:
        return Lq, Lq
    for t in (512, 256, 128):
        if Lq % t == 0:
            return t, Lq
    # Ragged long Lq: pad to a multiple of 256 so the working set stays bounded
    # on every generation (padded query rows are discarded wrapper-side).
    t = 256
    return t, ((Lq + t - 1) // t) * t


def _pick_kv_tile(Lk):
    if Lk <= 512:
        return Lk
    for t in (512, 256, 128):
        if Lk % t == 0:
            return t
    # TODO(synk): ragged long Lk would need an in-kernel key mask; fall back to
    # full-length K/V residency (still correct).
    return Lk


def _pick_head_block(H, other_parallel_steps, working_set, budget):
    """Largest head pack that fits VMEM and keeps >=4 parallel grid steps."""
    target = min(4, H * other_parallel_steps)        # v7x: 2 TCs want work each
    best = 1
    for hb in range(1, H + 1):
        if H % hb:
            continue
        if working_set(hb) > budget:
            continue
        if (H // hb) * other_parallel_steps < target:
            continue
        best = hb
    return best


def _bias_index3(b, h, i, *, mb, B, mh, H, mq, Lq):
    return (b if mb == B else 0,
            h if mh == H else 0,
            i if mq == Lq else 0,
            0)


def _bias_index4(b, h, i, j, *, mb, B, mh, H, mq, Lq, mk, Lk):
    return (b if mb == B else 0,
            h if mh == H else 0,
            i if mq == Lq else 0,
            j if mk == Lk else 0)


# ----------------------------------------------------------------- wrapper --

def scaled_dot_product_attention(q, k, v, temperature, mask=None,
                                 return_attn=True):
    """Pallas equivalent of ScaledDotProductAttention.forward (eval mode).

    return_attn=True matches the module's (output, attn) return.  The
    return_attn=False fast path drops the O(Lq*Lk) probability writeback and
    tiles the key length with an online softmax (flash-style).
    """
    B, H, Lq, Dk = q.shape
    _, _, Lk, Dv = v.shape
    inv_temperature = float(1.0 / float(temperature))
    itemsize = jnp.dtype(q.dtype).itemsize
    out_dtype = q.dtype

    budget, vmem_limit = _vmem_budgets()
    tq, Lq_pad = _pick_q_tile(Lq)
    if Lq_pad != Lq:
        q = jnp.pad(q, ((0, 0), (0, 0), (0, Lq_pad - Lq), (0, 0)))
    qsteps = Lq_pad // tq

    # Mask -> additive bias in its original broadcastable shape (bf16, tiny);
    # never broadcast to (B, H, Lq, Lk) in HBM.
    bias = None
    if mask is not None:
        m = jnp.asarray(mask)
        while m.ndim < 4:
            m = m[None]
        mb, mh, mq, mk = m.shape
        if (mb not in (1, B) or mh not in (1, H) or mq not in (1, Lq)
                or mk not in (1, Lk)):
            raise ValueError(f"mask shape {m.shape} not broadcastable to "
                             f"({B}, {H}, {Lq}, {Lk})")
        bias = jnp.where(m == 0, jnp.float32(-1e9),
                         jnp.float32(0.0)).astype(jnp.bfloat16)
        if mq == Lq and Lq_pad != Lq:
            bias = jnp.pad(bias, ((0, 0), (0, 0), (0, Lq_pad - Lq), (0, 0)))
            mq = Lq_pad

    # ---------------- full-Lk path: module semantics, attn is written back ---
    if return_attn:
        def working_set(hb):
            tiles = hb * (tq * Dk + Lk * Dk + Lk * Dv + tq * Dv
                          + tq * Lk) * itemsize          # double-buffered I/O
            f32_tmp = 3 * hb * tq * Lk * 4                # s / p / attn temps
            return 2 * tiles + f32_tmp

        hb = _pick_head_block(H, B * qsteps, working_set, budget)
        grid = (B, H // hb, qsteps)

        q_spec = pl.BlockSpec((None, hb, tq, Dk), lambda b, h, i: (b, h, i, 0))
        k_spec = pl.BlockSpec((None, hb, Lk, Dk), lambda b, h, i: (b, h, 0, 0))
        v_spec = pl.BlockSpec((None, hb, Lk, Dv), lambda b, h, i: (b, h, 0, 0))
        o_spec = pl.BlockSpec((None, hb, tq, Dv), lambda b, h, i: (b, h, i, 0))
        a_spec = pl.BlockSpec((None, hb, tq, Lk), lambda b, h, i: (b, h, i, 0))

        in_specs = [q_spec, k_spec, v_spec]
        args = [q, k, v]
        if bias is not None:
            blk = (None, hb if mh == H else 1, tq if mq == Lq_pad else 1,
                   Lk if mk == Lk else 1)
            in_specs.append(pl.BlockSpec(
                blk, partial(_bias_index3, mb=mb, B=B, mh=mh, H=H,
                             mq=mq, Lq=Lq_pad)))
            args.append(bias)

        out, attn = pl.pallas_call(
            _make_full_kernel(inv_temperature, bias is not None),
            grid=grid,
            in_specs=in_specs,
            out_specs=(o_spec, a_spec),
            out_shape=(jax.ShapeDtypeStruct((B, H, Lq_pad, Dv), out_dtype),
                       jax.ShapeDtypeStruct((B, H, Lq_pad, Lk), out_dtype)),
            compiler_params=pltpu.CompilerParams(
                dimension_semantics=("parallel", "parallel", "parallel"),
                vmem_limit_bytes=vmem_limit),
        )(*args)
        if Lq_pad != Lq:
            out = out[:, :, :Lq, :]
            attn = attn[:, :, :Lq, :]
        return out, attn

    # ---------------- flash path: kv-tiled online softmax, output only -------
    tk = _pick_kv_tile(Lk)
    kvsteps = Lk // tk

    def working_set(hb):
        tiles = hb * (tq * Dk + tk * Dk + tk * Dv + tq * Dv) * itemsize
        f32_tmp = 3 * hb * tq * tk * 4
        scratch = hb * tq * (Dv + 2) * 4
        return 2 * tiles + f32_tmp + scratch

    hb = _pick_head_block(H, B * qsteps, working_set, budget)
    grid = (B, H // hb, qsteps, kvsteps)

    q_spec = pl.BlockSpec((None, hb, tq, Dk), lambda b, h, i, j: (b, h, i, 0))
    k_spec = pl.BlockSpec((None, hb, tk, Dk), lambda b, h, i, j: (b, h, j, 0))
    v_spec = pl.BlockSpec((None, hb, tk, Dv), lambda b, h, i, j: (b, h, j, 0))
    o_spec = pl.BlockSpec((None, hb, tq, Dv), lambda b, h, i, j: (b, h, i, 0))

    in_specs = [q_spec, k_spec, v_spec]
    args = [q, k, v]
    if bias is not None:
        blk = (None, hb if mh == H else 1, tq if mq == Lq_pad else 1,
               tk if mk == Lk else 1)
        in_specs.append(pl.BlockSpec(
            blk, partial(_bias_index4, mb=mb, B=B, mh=mh, H=H,
                         mq=mq, Lq=Lq_pad, mk=mk, Lk=Lk)))
        args.append(bias)

    out = pl.pallas_call(
        _make_flash_kernel(inv_temperature, bias is not None),
        grid=grid,
        in_specs=in_specs,
        out_specs=o_spec,
        out_shape=jax.ShapeDtypeStruct((B, H, Lq_pad, Dv), out_dtype),
        scratch_shapes=[pltpu.VMEM((hb, tq, 1), jnp.float32),   # running max
                        pltpu.VMEM((hb, tq, 1), jnp.float32),   # running denom
                        pltpu.VMEM((hb, tq, Dv), jnp.float32)],  # accumulator
        compiler_params=pltpu.CompilerParams(
            dimension_semantics=("parallel", "parallel", "parallel",
                                 "arbitrary"),
            vmem_limit_bytes=vmem_limit),
    )(*args)
    if Lq_pad != Lq:
        out = out[:, :, :Lq, :]
    return out


# ------------------------------------------------------------------- tests --

if __name__ == "__main__":
    # ---- module-default path: returns (output, attn), small MHA shapes ----
    B, H, L, D = 2, 4, 8, 32
    temperature = math.sqrt(D)

    key = jax.random.PRNGKey(0)
    kq, kk, kv_ = jax.random.split(key, 3)
    q = jax.random.normal(kq, (B, H, L, D), dtype=jnp.float32)
    k = jax.random.normal(kk, (B, H, L, D), dtype=jnp.float32)
    v = jax.random.normal(kv_, (B, H, L, D), dtype=jnp.float32)

    out, attn = scaled_dot_product_attention(q, k, v, temperature)
    jax.block_until_ready((out, attn))

    scores = jnp.einsum("bhqd,bhkd->bhqk", q / temperature, k)
    attn_ref = jax.nn.softmax(scores, axis=-1)
    out_ref = jnp.einsum("bhqk,bhkd->bhqd", attn_ref, v)
    assert jnp.allclose(attn, attn_ref, atol=2e-3), "attn mismatch (no mask)"
    assert jnp.allclose(out, out_ref, atol=2e-3), "output mismatch (no mask)"

    # ---- masked path: causal mask in its broadcastable (1,1,L,L) shape ----
    causal = jnp.tril(jnp.ones((L, L), dtype=jnp.int32))[None, None]
    out_m, attn_m = scaled_dot_product_attention(q, k, v, temperature,
                                                 mask=causal)
    jax.block_until_ready((out_m, attn_m))

    scores_m = jnp.where(causal == 0, jnp.float32(-1e9), scores)
    attn_m_ref = jax.nn.softmax(scores_m, axis=-1)
    out_m_ref = jnp.einsum("bhqk,bhkd->bhqd", attn_m_ref, v)
    assert jnp.allclose(attn_m, attn_m_ref, atol=2e-3), "attn mismatch (mask)"
    assert jnp.allclose(out_m, out_m_ref, atol=2e-3), "output mismatch (mask)"

    # ---- flash fast path (return_attn=False): multi-step kv online softmax --
    B2, H2, Lq2, Lk2, D2 = 1, 2, 128, 1024, 32
    temperature2 = math.sqrt(D2)
    kq2, kk2, kv2 = jax.random.split(jax.random.PRNGKey(1), 3)
    q2 = jax.random.normal(kq2, (B2, H2, Lq2, D2), dtype=jnp.float32)
    k2 = jax.random.normal(kk2, (B2, H2, Lk2, D2), dtype=jnp.float32)
    v2 = jax.random.normal(kv2, (B2, H2, Lk2, D2), dtype=jnp.float32)

    out2 = scaled_dot_product_attention(q2, k2, v2, temperature2,
                                        return_attn=False)
    jax.block_until_ready(out2)

    scores2 = jnp.einsum("bhqd,bhkd->bhqk", q2 / temperature2, k2)
    out2_ref = jnp.einsum("bhqk,bhkd->bhqd",
                          jax.nn.softmax(scores2, axis=-1), v2)
    assert jnp.allclose(out2, out2_ref, atol=2e-3), "output mismatch (flash)"

    # ---- flash fast path with a key-padding mask of shape (1,1,1,Lk) --------
    keep = (jnp.arange(Lk2) < (Lk2 - 256)).astype(jnp.int32)[None, None, None]
    out3 = scaled_dot_product_attention(q2, k2, v2, temperature2, mask=keep,
                                        return_attn=False)
    jax.block_until_ready(out3)

    scores3 = jnp.where(keep == 0, jnp.float32(-1e9), scores2)
    out3_ref = jnp.einsum("bhqk,bhkd->bhqd",
                          jax.nn.softmax(scores3, axis=-1), v2)
    assert jnp.allclose(out3, out3_ref, atol=2e-3), \
        "output mismatch (flash + mask)"

    print("KERNEL_OK")
</pallas_src>

<mosaic_0001>
module attributes {stable_mosaic.version = 11 : i64} {
  func.func @kernel(%arg0: i32, %arg1: i32, %arg2: i32, %arg3: memref<1x2x8x32xf32, #tpu.memory_space<vmem>>, %arg4: memref<1x2x8x32xf32, #tpu.memory_space<vmem>>, %arg5: memref<1x2x8x32xf32, #tpu.memory_space<vmem>>, %arg6: memref<1x2x8x32xf32, #tpu.memory_space<vmem>>, %arg7: memref<1x2x8x8xf32, #tpu.memory_space<vmem>>) attributes {dimension_semantics = [#tpu.dimension_semantics<parallel>, #tpu.dimension_semantics<parallel>, #tpu.dimension_semantics<parallel>], iteration_bounds = array<i64: 2, 2, 1>, scalar_prefetch = 0 : i64, scratch_operands = 0 : i64, tpu.core_type = #tpu.core_type<tc>, window_params = [{transform_indices = @transform_0, window_bounds = array<i64: 1, 2, 8, 32>}, {transform_indices = @transform_1, window_bounds = array<i64: 1, 2, 8, 32>}, {transform_indices = @transform_2, window_bounds = array<i64: 1, 2, 8, 32>}, {transform_indices = @transform_3, window_bounds = array<i64: 1, 2, 8, 32>}, {transform_indices = @transform_4, window_bounds = array<i64: 1, 2, 8, 8>}]} {
    %c0 = arith.constant 0 : index
    %c0_0 = arith.constant 0 : index
    %c0_1 = arith.constant 0 : index
    %c0_2 = arith.constant 0 : index
    %0 = vector.load %arg3[%c0, %c0_0, %c0_1, %c0_2] : memref<1x2x8x32xf32, #tpu.memory_space<vmem>>, vector<1x2x8x32xf32>
    %1 = vector.shape_cast %0 : vector<1x2x8x32xf32> to vector<2x8x32xf32>
    %c0_3 = arith.constant 0 : index
    %c0_4 = arith.constant 0 : index
    %c0_5 = arith.constant 0 : index
    %c0_6 = arith.constant 0 : index
    %2 = vector.load %arg4[%c0_3, %c0_4, %c0_5, %c0_6] : memref<1x2x8x32xf32, #tpu.memory_space<vmem>>, vector<1x2x8x32xf32>
    %3 = vector.shape_cast %2 : vector<1x2x8x32xf32> to vector<2x8x32xf32>
    %c0_7 = arith.constant 0 : index
    %c0_8 = arith.constant 0 : index
    %c0_9 = arith.constant 0 : index
    %c0_10 = arith.constant 0 : index
    %4 = vector.load %arg5[%c0_7, %c0_8, %c0_9, %c0_10] : memref<1x2x8x32xf32, #tpu.memory_space<vmem>>, vector<1x2x8x32xf32>
    %5 = vector.shape_cast %4 : vector<1x2x8x32xf32> to vector<2x8x32xf32>
    %cst = arith.constant dense<0.000000e+00> : vector<2x8x8xf32>
    %6 = tpu.matmul %1, %3, %cst {dimension_numbers = #tpu.dot_dimension_numbers<[2], [2], [1], [1], [0, 0, 0, 1, 1, 1], [0], [0]>} : vector<2x8x32xf32>, vector<2x8x32xf32>, vector<2x8x8xf32> -> vector<2x8x8xf32>
    %cst_11 = arith.constant 0.176776692 : f32
    %7 = vector.broadcast %cst_11 : f32 to vector<2x8x8xf32>
    %8 = arith.mulf %6, %7 : vector<2x8x8xf32>
    %cst_12 = arith.constant dense<0xFF800000> : vector<2x8xf32>
    %9 = vector.multi_reduction <maximumf>, %8, %cst_12 [2] : vector<2x8x8xf32> to vector<2x8xf32>
    %10 = vector.shape_cast %9 : vector<2x8xf32> to vector<2x8x1xf32>
    %11 = vector.broadcast %10 : vector<2x8x1xf32> to vector<2x8x8xf32>
    %12 = arith.subf %8, %11 : vector<2x8x8xf32>
    %13 = math.exp %12 : vector<2x8x8xf32>
    %cst_13 = arith.constant dense<0.000000e+00> : vector<2x8xf32>
    %14 = vector.multi_reduction <add>, %13, %cst_13 [2] : vector<2x8x8xf32> to vector<2x8xf32>
    %15 = vector.shape_cast %14 : vector<2x8xf32> to vector<2x8x1xf32>
    %16 = tpu.reciprocal %15 : vector<2x8x1xf32> -> vector<2x8x1xf32>
    %17 = vector.broadcast %16 : vector<2x8x1xf32> to vector<2x8x8xf32>
    %18 = arith.mulf %13, %17 : vector<2x8x8xf32>
    %cst_14 = arith.constant dense<0.000000e+00> : vector<2x8x32xf32>
    %19 = tpu.matmul %18, %5, %cst_14 {dimension_numbers = #tpu.dot_dimension_numbers<[2], [1], [1], [2], [0, 0, 0, 1, 1, 2], [0], [0]>} : vector<2x8x8xf32>, vector<2x8x32xf32>, vector<2x8x32xf32> -> vector<2x8x32xf32>
    %c0_15 = arith.constant 0 : index
    %c0_16 = arith.constant 0 : index
    %c0_17 = arith.constant 0 : index
    %c0_18 = arith.constant 0 : index
    %20 = vector.load %arg6[%c0_15, %c0_16, %c0_17, %c0_18] : memref<1x2x8x32xf32, #tpu.memory_space<vmem>>, vector<1x2x8x32xf32>
    %21 = vector.shape_cast %20 : vector<1x2x8x32xf32> to vector<2x8x32xf32>
    %22 = vector.shape_cast %19 : vector<2x8x32xf32> to vector<1x2x8x32xf32>
    tpu.vector_store %arg6[%c0_15, %c0_16, %c0_17, %c0_18], %22 {strides = array<i32>} : memref<1x2x8x32xf32, #tpu.memory_space<vmem>>, vector<1x2x8x32xf32>,
    %c0_19 = arith.constant 0 : index
    %c0_20 = arith.constant 0 : index
    %c0_21 = arith.constant 0 : index
    %c0_22 = arith.constant 0 : index
    %23 = vector.load %arg7[%c0_19, %c0_20, %c0_21, %c0_22] : memref<1x2x8x8xf32, #tpu.memory_space<vmem>>, vector<1x2x8x8xf32>
    %24 = vector.shape_cast %23 : vector<1x2x8x8xf32> to vector<2x8x8xf32>
    %25 = vector.shape_cast %18 : vector<2x8x8xf32> to vector<1x2x8x8xf32>
    tpu.vector_store %arg7[%c0_19, %c0_20, %c0_21, %c0_22], %25 {strides = array<i32>} : memref<1x2x8x8xf32, #tpu.memory_space<vmem>>, vector<1x2x8x8xf32>,
    return
  }
  func.func @transform_0(%arg0: i32, %arg1: i32, %arg2: i32) -> (i32, i32, i32, i32) {
    %c0_i32 = arith.constant 0 : i32
    %c0_i32_0 = arith.constant 0 : i32
    return %arg0, %arg1, %arg2, %c0_i32 : i32, i32, i32, i32
  }
  func.func @transform_1(%arg0: i32, %arg1: i32, %arg2: i32) -> (i32, i32, i32, i32) {
    %c0_i32 = arith.constant 0 : i32
    %c0_i32_0 = arith.constant 0 : i32
    %c0_i32_1 = arith.constant 0 : i32
    return %arg0, %arg1, %c0_i32, %c0_i32_0 : i32, i32, i32, i32
  }
  func.func @transform_2(%arg0: i32, %arg1: i32, %arg2: i32) -> (i32, i32, i32, i32) {
    %c0_i32 = arith.constant 0 : i32
    %c0_i32_0 = arith.constant 0 : i32
    %c0_i32_1 = arith.constant 0 : i32
    return %arg0, %arg1, %c0_i32, %c0_i32_0 : i32, i32, i32, i32
  }
  func.func @transform_3(%arg0: i32, %arg1: i32, %arg2: i32) -> (i32, i32, i32, i32) {
    %c0_i32 = arith.constant 0 : i32
    %c0_i32_0 = arith.constant 0 : i32
    return %arg0, %arg1, %arg2, %c0_i32 : i32, i32, i32, i32
  }
  func.func @transform_4(%arg0: i32, %arg1: i32, %arg2: i32) -> (i32, i32, i32, i32) {
    %c0_i32 = arith.constant 0 : i32
    %c0_i32_0 = arith.constant 0 : i32
    return %arg0, %arg1, %arg2, %c0_i32 : i32, i32, i32, i32
  }
}

</mosaic_0001>

<bundles_post_ra>
// kernel: tpu_custom_call.1
= control target key start
LH: loop header
LB: loop body
LE: loop exit
PB: predicated region body
PF: predicated region fallthrough
CT: control target
= control target key end

     0   :  { %s1360_s0 = inlined_call_operand.hbm [shape: f32[2,4,8,32], index: 0, kind: input, shape index: {}]   ;;  %s1361_s1 = inlined_call_operand.hbm [shape: f32[2,4,8,32], index: 1, kind: input, shape index: {}]   ;;  %s1362_s2 = inlined_call_operand.hbm [shape: f32[2,4,8,32], index: 2, kind: input, shape index: {}]   ;;  %s1363_s3 = inlined_call_operand.hbm [shape: f32[2,4,8,32], index: 3, kind: output, shape index: {0}]   ;;  %s1364_s4 = inlined_call_operand.hbm [shape: f32[2,4,8,8], index: 4, kind: output, shape index: {1}]  }
   0x1   :  { %1374 = sst [smem:[#allocation24_spill]] %s1361_s1 }
   0x2   :  { %10 = vsyncpa [#allocation3], 0 }
   0x3   :  { %12 = vsyncpa [#allocation3 + $0x1], 0 }
   0x4   :  { %13 = vsyncpa [#allocation6], 0 }
   0x5   :  { %15 = vsyncpa [#allocation6 + $0x1], 0 }
   0x6   :  { %16 = vsyncpa [#allocation4], 0 }
   0x7   :  { %18 = vsyncpa [#allocation4 + $0x1], 0 }
   0x8   :  { %19 = vsyncpa [#allocation10], 0 }
   0x9   :  { %21 = vsyncpa [#allocation10 + $0x1], 0  ;;  %s1140_s15 = smov 0   ;;  %s1142_s16 = smov 0  }
   0xa   :  { %s1144_s17 = smov 0   ;;  %s1146_s18 = smov 0  }
   0xb   :  { %s1148_s19 = smov 0   ;;  %s1150_s20 = smov 0  }
   0xc   :  { %s1152_s21 = smov 0   ;;  %s1154_s22 = smov 0  }
   0xd LB: > { %1375 = sst [smem:[#allocation15_spill]] %s1081_s15  ;;  %s1181_s23 = sadd.s32 4294967295, %s1109_s22   ;;  %s1109_s22 = sphi %s1154_s22, %s27_s22   ;;  %s1105_s21 = sphi %s1152_s21, %s1399_s21   ;;  %s1101_s20 = sphi %s1150_s20, %s1398_s20   ;;  %s1097_s19 = sphi %s1148_s19, %s1397_s19   ;;  %s1093_s18 = sphi %s1146_s18, %s1396_s18   ;;  %s1089_s17 = sphi %s1144_s17, %s1395_s17   ;;  %s1085_s16 = sphi %s1142_s16, %s1401_s16   ;;  %s1081_s15 = sphi %s1140_s15, %s1400_s15  }
   0xe   : > { %1376 = sst [smem:[#allocation16_spill]] %s1089_s17  ;;  %s743_s24 = sadd.s32 4294967294, %s1109_s22  }
   0xf   : > { %1377 = sst [smem:[#allocation17_spill]] %s1101_s20  ;;  %s42_s25 = sadd.s32 1, %s1101_s20 }
  0x10   : > { %1378 = sst [smem:[#allocation18_spill]] %s1105_s21  ;;  %s46_s26 = sadd.s32 1, %s1105_s21 }
  0x11   : > { %1379 = sst [smem:[#allocation19_spill]] %s1109_s22  ;;  %p44_p0 = scmp.ge.s32.totalorder %s42_s25, 2 }
  0x12   : > { %s57_s27 = sadd.s32 1, %s1089_s17  ;;  %p64_p1 = scmp.ne.s32.totalorder %s1089_s17, %s1085_s16 }
  0x13   : > { %p65_p2 = scmp.eq.s32.totalorder %s1109_s22, 0  ;;  %s1403_s25 = smov (%p44_p0, %s42_s25), 0 }
  0x14   : > { %1380 = sst [smem:[#allocation20_spill]] %s1403_s25  ;;  %s1405_s26 = smov (!%p44_p0, %s46_s26), %s1105_s21 }
  0x15   : > { %s51_s28 = ssub.s32 %s1101_s20, %s1403_s25  ;;  %p1195_p3 = por %p65_p2, %p64_p1 }
  0x16   : > { %p48_p4 = scmp.ge.s32.totalorder %s1405_s26, 2  ;;  %p70_p5 = scmp.ne.s32.totalorder %s1085_s16, %s1081_s15 }
  0x17   : > { %p71_p6 = scmp.eq.s32.totalorder %s1181_s23, 0  ;;  %p154_p7 = scmp.eq.s32.totalorder %s1181_s23, 3 }
  0x18   : > { %s1407_s26 = smov (%p48_p4, %s1405_s26), 0  ;;  %p160_p10 = scmp.eq.s32.totalorder %s743_s24, 3 }
  0x19   : > { %1382 = sst [smem:[#allocation21_spill]] %s1407_s26  ;;  %p1205_p8 = por %p71_p6, %p70_p5 }
  0x1a   : > { %p1209_p9 = por %p154_p7, %p64_p1  ;;  %s50_s6 = ssub.s32 %s1105_s21, %s1407_s26 }
  0x1b   : > { %s52_s7 = sor.u32 %s51_s28, %s50_s6  ;;  %p1215_p12 = por %p160_p10, %p70_p5 }
  0x1c   : > { %p55_p11 = scmp.eq.s32.totalorder %s52_s7, 0  ;;  %p807_p13 = scmp.lt.s32.totalorder %s1109_s22, 4 }
  0x1d   : > { %s1385_s8 = scalar_select %p1215_p12, 1, 0 }
  0x1e   : > { %s210_s9 = sand.u32 1, %s1089_s17   ;;  %s747_s12 = sshll.u32 %s1101_s20, 1 }
  0x1f   : > { %1386 = sst [smem:[#allocation22_spill]] %s1385_s8  ;;  %s1224_s11 = sshll.u32 %s210_s9, 4 }
  0x20   : > { %s1222_s10 = scalar_select %p55_p11, %s1089_s17, %s57_s27  }
  0x21   : > { %s748_s13 = sshll.u32 %s1105_s21, 2  ;;  %p1230_p0 = pnand %p807_p13, %p1195_p3 }
  0x22   : > { %1387 = sst [smem:[#allocation23_spill]] %s1222_s10  ;;  %s220_s24 = sadd.s32 %s748_s13, %s747_s12 }
  0x23   : > { %s749_s28 = sshll.u32 %s220_s24, 3  ;;  %s235_s6 = sand.u32 1, %s1109_s22  }
  0x24   : > { %s1389_s1 = sld [smem:[#allocation24_spill]]  ;;  %s239_s25 = scalar_lea.vmem [#allocation5], %s1224_s11 }
  0x25   : > { %s249_s10 = sshll.u32 %s239_s25, 4  ;;  %p758_p1 = scmp.ge.s32.totalorder %s1109_s22, 1  ;;  %s250_s10 = int_to_ptr.vmem [resolvable:$true] %s249_s10 }
  0x26   : > { %s236_s29 = scalar_lea.sflag [#allocation6], %s235_s6  ;;  %s1111_s21 = smov 128  }
  0x27   : > { %s1112_s20 = smov 8   ;;  %p281_p2 = scmp.lt.s32.totalorder %s1109_s22, 5 }
  0x28   : > { %s222_s25 = scalar_lea.hbm %s1360_s0, %s749_s28  ;;  %s214_s24 = scalar_lea.vmem [#allocation2], %s1224_s11 }
  0x29   : > { %p1243_p3 = pnand %p758_p1, %p281_p2  ;;  %s225_s7 = sshll.u32 %s214_s24, 4  ;;  %s226_s7 = int_to_ptr.vmem [resolvable:$true] %s225_s7 }
  0x2a   : > { %s246_s27 = scalar_lea.hbm %s1389_s1, %s749_s28  ;;  %s211_s6 = scalar_lea.sflag [#allocation3], %s210_s9 }
  0x2b   : > { %s247_s17 = sshll.u32 %s246_s27, 4  ;;  %s223_s27 = sshll.u32 %s222_s25, 4  ;;  %s248_s17 = int_to_ptr.hbm [resolvable:$true] %s247_s17  ;;  %s224_s27 = int_to_ptr.hbm [resolvable:$true] %s223_s27 }
  0x2c   : > { %796 = dma.hbm_to_vmem [thread:$0]  (!%p1230_p0), %s248_s17, 256, %s250_s10, %s236_s29, %s1111_s21, %s1111_s21, %s1112_s20  }
  0x2d   : > { %793 = dma.hbm_to_vmem [thread:$0]  (!%p1230_p0), %s224_s27, 256, %s226_s7, %s211_s6, %s1111_s21, %s1111_s21, %s1112_s20  }
  0x2e   : > { %s270_s10 = scalar_lea.hbm %s1362_s2, %s749_s28  ;;  %s263_s8 = scalar_lea.vmem [#allocation7], %s1224_s11 }
  0x2f   : > { %s273_s15 = sshll.u32 %s263_s8, 4  ;;  %s271_s22 = sshll.u32 %s270_s10, 4  ;;  %s274_s15 = int_to_ptr.vmem [resolvable:$true] %s273_s15  ;;  %s272_s22 = int_to_ptr.hbm [resolvable:$true] %s271_s22 }
  0x30   : > { %799 = dma.hbm_to_vmem [thread:$0]  (!%p1230_p0), %s272_s22, 256, %s274_s15, %s236_s29, %s1111_s21, %s1111_s21, %s1112_s20  }
  0x31   : > { %285 = sbr.rel (%p1243_p3) target bundleno = 597 (0x255), region = 32  ;;  %s1262_s26 = sand.u32 (!%p1243_p3), 1, %s1085_s16  }
  0x32   : > { %s1265_s9 = sshll.u32 (!%p1243_p3), %s1262_s26, 4  ;;  %s288_s1 = scalar_lea.sflag (!%p1243_p3), [#allocation3], %s1262_s26 }
  0x33   : > { %s291_s11 = scalar_lea.vmem (!%p1243_p3), [#allocation2], %s1265_s9 }
  0x36   : > { %1064 = dma.done.wait (%p1205_p8), %s288_s1, 256  }
  0x37   : > { %1066 = vsyncadd (%p1205_p8), %s288_s1, 4294967040  ;;  %s297_s15 = sand.u32 1, %s1181_s23   ;;  %s301_s21 = scalar_lea.vmem [#allocation5], %s1265_s9 }
  0x38   : > { %s298_s20 = scalar_lea.sflag [#allocation6], %s297_s15 }
  0x39   : > { %1068 = dma.done.wait (%p1205_p8), %s298_s20, 512  }
  0x3a   : > { %1070 = vsyncadd (%p1205_p8), %s298_s20, 4294966784  ;;  %vm363_vm0 = vcmask 261120   ;;  %v359_v0 = vld [vmem:[%s301_s21] sm:$0xff]  ;;  %v360_v1 = vld [vmem:[%s301_s21 + $0x8] sm:$0xff]  ;;  %vm418_vm1 = vcmask 64512   ;;  %s311_s22 = scalar_lea.vmem [#allocation7], %s1265_s9 }
  0x3b   : > { %764 = vmatpush.xpose.msk.msra.mxu0 %vm363_vm0, %v359_v0  ;;  %v357_v2 = vld [vmem:[%s291_s11] sm:$0xff]  ;;  %766 = vmatpush.xpose.msk.msra.mxu1 %vm363_vm0, %v360_v1  ;;  %v358_v3 = vld [vmem:[%s291_s11 + $0x8] sm:$0xff]  ;;  %s351_s23 = scalar_lea.vmem [#allocation9], %s1265_s9  ;;  %s772_s30 = sshll.u32 %s1093_s18, 1 }
  0x3c   : > { %v361_v20 = vld [vmem:[%s311_s22] sm:$0xff]  ;;  %v362_v21 = vld [vmem:[%s311_s22 + $0x8] sm:$0xff]  ;;  %s773_s8 = sshll.u32 %s1097_s19, 2  ;;  %s558_s29 = sshll.u32 %s351_s23, 4  ;;  %s559_s29 = int_to_ptr.vmem [resolvable:$true] %s558_s29 }
  0x3d   : > { %485 = vmatpush.msra.mxu2 %v361_v20  ;;  %508 = vmatpush.msra.mxu3 %v362_v21  ;;  %s535_s14 = sadd.s32 %s773_s8, %s772_s30  ;;  %s523_s7 = scalar_lea.sflag [#allocation10], %s1262_s26 }
  0x3e   : > { %765 = vmatmul.msk.f32.vlgmr.msra.gmra.mxu0 %vm363_vm0, %v357_v2  ;;  %767 = vmatmul.msk.f32.vlgmr.msra.gmra.mxu1 %vm363_vm0, %v358_v3  ;;  %s774_s28 = sshll.u32 %s535_s14, 3  ;;  %s995_s17 = scalar_lea.hbm %s1364_s4, 64 }
  0x3f   : > { %s557_s25 = scalar_lea.hbm %s1364_s4, %s774_s28 }
  0x40   : > { %s560_s24 = sshll.u32 %s557_s25, 4  ;;  %s561_s24 = int_to_ptr.hbm [resolvable:$true] %s560_s24 }
  0x41   : > { %s989_s27 = sshra.s32 %s561_s24, 4  ;;  %s990_s27 = int_to_ptr.hbm [resolvable:$true] %s989_s27 }
  0x42   : > { %s991_s18 = scalar_lea.hbm %s990_s27, 16  ;;  %p996_p7 = scmp.lt.s32.totalorder %s990_s27, %s1364_s4 }
  0x43   : > { %p992_p4 = scmp.ne.s32.totalorder %s990_s27, %s991_s18  ;;  %p997_p8 = scmp.lt.s32.totalorder %s995_s17, %s991_s18 }
  0x45   : > { %p993_p5 = pnand %p992_p4, %p1209_p9  ;;  %p998_p10 = por %p997_p8, %p996_p7 }
  0x47   : > { %p994_p6 = pneg %p993_p5 }
  0x49   : > { %p999_p11 = pnand %p998_p10, %p994_p6 }
  0xbb   : > { %v387_v4 = vpop.f32.mrf.mxu0  ;;  %v413_v6 = vpop.f32.mrf.mxu1 }
  0xbc   : > { %v416_v5 = vmul.f32 0.17677669, %v387_v4  ;;  %v417_v8 = vmul.f32 0.17677669, %v413_v6 }
  0xbe   : > { %v419_v7 = vsel %vm418_vm1, %v416_v5, -inf  ;;  %v422_v9 = vsel %vm418_vm1, %v417_v8, -inf }
  0xbf   : > { %420 = vmax.xlane.f32.xlu0 %v419_v7 }
  0xc7   : > { %423 = vmax.xlane.f32.xlu0 %v422_v9 }
 0x132   : > { %v421_v10 = vpop.xlane.xlu0 %420 }
 0x133   : > { %v425_v11 = vsub.f32 %v416_v5, %v421_v10 }
 0x135   : > { %v427_v12 = vmul.f32 1.442695, %v425_v11 }
 0x137   : > { %877 = vpow2.f32 %v427_v12 }
 0x13a   : > { %v424_v13 = vpop.xlane.xlu0 %423 }
 0x13b   : > { %v426_v14 = vsub.f32 %v417_v8, %v424_v13 }
 0x13d   : > { %v878_v15 = vpop.eup %877  ;;  %v429_v16 = vmul.f32 1.442695, %v426_v14 }
 0x13e   : > { %v431_v17 = vsel %vm418_vm1, %v878_v15, 0.0 }
 0x13f   : > { %879 = vpow2.f32 %v429_v16  ;;  %432 = vadd.xlane.f32.xlu1 %v431_v17 }
 0x145   : > { %v880_v18 = vpop.eup %879 }
 0x146   : > { %v434_v19 = vsel %vm418_vm1, %v880_v18, 0.0 }
 0x147   : > { %435 = vadd.xlane.f32.xlu1 %v434_v19 }
 0x1b2   : > { %v433_v22 = vpop.xlane.xlu1 %432 }
 0x1b3   : > { %881 = vrcp.f32 %v433_v22  ;;  %v448_v27 = vand.u32 2147483648, %v433_v22  ;;  %v446_v29 = vand.u32 2147483647, %v433_v22  ;;  %vm442_vm3 = vweird.f32 %v433_v22 }
 0x1b5   : > { %v449_v32 = vor.u32 1.1754944e-38, %v448_v27  ;;  %vm447_vm5 = vcmp.eq.f32.partialorder %v446_v29, 8.507059e+37 }
 0x1b9   : > { %v882_v23 = vpop.eup %881 }
 0x1ba   : > { %v438_v24 = vmul.f32 %v882_v23, %v433_v22  ;;  %v436_v25 = vpop.xlane.xlu1 %435  ;;  %vm443_vm2 = vweird.f32 %v882_v23 }
 0x1bb   : > { %883 = vrcp.f32 %v436_v25  ;;  %vm444_vm4 = vmor %vm442_vm3, %vm443_vm2  ;;  %v462_v38 = vand.u32 2147483648, %v436_v25  ;;  %v460_v40 = vand.u32 2147483647, %v436_v25  ;;  %vm456_vm7 = vweird.f32 %v436_v25 }
 0x1bc   : > { %v439_v26 = vsub.f32 1.0, %v438_v24 }
 0x1bd   : > { %v463_v42 = vor.u32 1.1754944e-38, %v462_v38  ;;  %vm461_vm9 = vcmp.eq.f32.partialorder %v460_v40, 8.507059e+37 }
 0x1be   : > { %v440_v28 = vmul.f32 %v882_v23, %v439_v26 }
 0x1c0   : > { %v441_v30 = vadd.f32 %v882_v23, %v440_v28 }
 0x1c1   : > { %v884_v31 = vpop.eup %883 }
 0x1c2   : > { %v452_v33 = vmul.f32 %v884_v31, %v436_v25  ;;  %v445_v34 = vsel %vm444_vm4, %v882_v23, %v441_v30  ;;  %vm457_vm6 = vweird.f32 %v884_v31 }
 0x1c3   : > { %v450_v35 = vsel %vm447_vm5, %v449_v32, %v445_v34  ;;  %vm458_vm8 = vmor %vm456_vm7, %vm457_vm6 }
 0x1c4   : > { %v453_v36 = vsub.f32 1.0, %v452_v33  ;;  %v465_v37 = vmul.f32 %v878_v15, %v450_v35 }
 0x1c6   : > { %v454_v39 = vmul.f32 %v884_v31, %v453_v36  ;;  %768 = vmatmul.msk.f32.vlgmr.msra.gmra.mxu2 %vm418_vm1, %v465_v37  ;;  %515 = vst.msk [vmem:[%s351_s23] sm:$0xff] %vm418_vm1, %v465_v37 }
 0x1c8   : > { %v455_v41 = vadd.f32 %v884_v31, %v454_v39 }
 0x1ca   : > { %v459_v43 = vsel %vm458_vm8, %v884_v31, %v455_v41 }
 0x1cb   : > { %v464_v44 = vsel %vm461_vm9, %v463_v42, %v459_v43 }
 0x1cc   : > { %v466_v45 = vmul.f32 %v880_v18, %v464_v44 }
 0x1ce   : > { %769 = vmatmul.msk.f32.vlgmr.msra.gmra.mxu3 %vm418_vm1, %v466_v45  ;;  %516 = vst.msk [vmem:[%s351_s23 + $0x8] sm:$0xff] %vm418_vm1, %v466_v45 }
 0x1cf   : > { %1002 = shalt.err (!%p999_p11)
}
 0x1d0   : > { %s1113_s11 = smov 128   ;;  %s1114_s15 = smov 8  }
 0x1d1   : > { %787 = dma.vmem_to_hbm [thread:$0]  (%p1209_p9), %s559_s29, 256, %s561_s24, %s523_s7, %s1113_s11, %s1113_s11, %s1114_s15  }
 0x1d2   : > { %s344_s20 = scalar_lea.vmem [#allocation8], %s1265_s9  ;;  %s537_s23 = scalar_lea.hbm %s1363_s3, %s774_s28 }
 0x1d3   : > { %s538_s30 = sshll.u32 %s344_s20, 4  ;;  %s540_s8 = sshll.u32 %s537_s23, 4  ;;  %s539_s30 = int_to_ptr.vmem [resolvable:$true] %s538_s30  ;;  %s541_s8 = int_to_ptr.hbm [resolvable:$true] %s540_s8 }
 0x1d4   : > { %s518_s14 = scalar_lea.sflag [#allocation4], %s1262_s26  ;;  %s1017_s12 = sshra.s32 %s541_s8, 4  ;;  %s1018_s12 = int_to_ptr.hbm [resolvable:$true] %s1017_s12 }
 0x1d5   : > { %s1019_s29 = scalar_lea.hbm %s1018_s12, 16  ;;  %s1023_s25 = scalar_lea.hbm %s1363_s3, 64 }
 0x1d6   : > { %p1020_p13 = scmp.ne.s32.totalorder %s1018_s12, %s1019_s29  ;;  %p1024_p2 = scmp.lt.s32.totalorder %s1018_s12, %s1363_s3 }
 0x1d7   : > { %p1025_p3 = scmp.lt.s32.totalorder %s1023_s25, %s1019_s29 }
 0x1d8   : > { %p1021_p0 = pnand %p1020_p13, %p1209_p9 }
 0x1d9   : > { %p1026_p4 = por %p1025_p3, %p1024_p2 }
 0x1da   : > { %p1022_p1 = pneg %p1021_p0 }
 0x1dc   : > { %p1027_p5 = pnand %p1026_p4, %p1022_p1 }
 0x249   : > { %v487_v46 = vpop.f32.mrf.mxu2 }
 0x24a   : > { %513 = vst.msk [vmem:[%s344_s20] sm:$0xff] %vm363_vm0, %v487_v46 }
 0x251   : > { %v510_v47 = vpop.f32.mrf.mxu3 }
 0x252   : > { %514 = vst.msk [vmem:[%s344_s20 + $0x8] sm:$0xff] %vm363_vm0, %v510_v47 }
 0x253   : > { %1030 = shalt.err (!%p1027_p5)
}
 0x254   : > { %786 = dma.vmem_to_hbm [thread:$0]  (%p1209_p9), %s539_s30, 256, %s541_s8, %s518_s14, %s1113_s11, %s1113_s11, %s1114_s15  }
 0x255 PF: > { %s1391_s26 = sld [smem:[#allocation19_spill]] }
 0x256   : > { %s1392_s7 = sld [smem:[#allocation15_spill]] }
 0x25b   : > { %p808_p6 = scmp.ge.s32.totalorder %s1391_s26, 2 }
 0x25c   : > { %s575_s18 = sand.u32 1, %s1392_s7  }
 0x25d   : > { %p801_p7 = pnand %p808_p6, %p1215_p12  ;;  %s576_s19 = scalar_lea.sflag [#allocation4], %s575_s18 }
 0x25f   : > { %p802_p8 = pneg %p801_p7 }
 0x261   : > { %1072 = dma.done.wait (%p802_p8), %s576_s19, 256  }
 0x262   : > { %1074 = vsyncadd (%p802_p8), %s576_s19, 4294967040  ;;  %s586_s6 = scalar_lea.sflag [#allocation10], %s575_s18 }
 0x263   : > { %1076 = dma.done.wait (%p802_p8), %s586_s6, 256  }
 0x264   : > { %1078 = vsyncadd (%p802_p8), %s586_s6, 4294967040  ;;  %s27_s22 = sadd.s32 1, %s1391_s26   ;;  %s1394_s5 = sld [smem:[#allocation16_spill]] }
 0x265   : > { %p24_p10 = scmp.ge.s32.totalorder %s27_s22, 6   ;;  %s1395_s17 = sld [smem:[#allocation23_spill]] }
 0x266   : > { %s1396_s18 = sld [smem:[#allocation17_spill]]  ;;  %s1400_s15 = smov %s1085_s16 }
 0x267   : > { %s1397_s19 = sld [smem:[#allocation18_spill]]  ;;  %26 = sbr.rel (!%p24_p10) target bundleno = 13 (0xd), region = 118 }
 0x268   : > { %s1398_s20 = sld [smem:[#allocation20_spill]] }
 0x269   : > { %s1399_s21 = sld [smem:[#allocation21_spill]] }
 0x26a   : > { %s1401_s16 = smov %s1394_s5 }
 0x26c   :  { %592 = vsyncpa [#allocation3], 1 }
 0x26d   :  { %594 = vsyncpa [#allocation3 + $0x1], 1 }
 0x26e   :  { %595 = vsyncpa [#allocation6], 1 }
 0x26f   :  { %597 = vsyncpa [#allocation6 + $0x1], 1 }
 0x270   :  { %598 = vsyncpa [#allocation4], 1 }
 0x271   :  { %600 = vsyncpa [#allocation4 + $0x1], 1 }
 0x272   :  { %601 = vsyncpa [#allocation10], 1 }
 0x273   :  { %603 = vsyncpa [#allocation10 + $0x1], 1 }

</bundles_post_ra>
